<compile_context>
chip_gen: v7x
topology: tpu7x:2x2x1
jax: 0.10.0
libtpu: 0.0.40
codegen_flags: <defaults>
</compile_context>

<pallas_src>
import functools

import jax
import jax.numpy as jnp
import numpy as np
from jax import lax
from jax.experimental import pallas as pl
from jax.experimental.pallas import tpu as pltpu

_CDT = jnp.bfloat16      # MXU operand dtype (accumulation stays float32)
_LANE = 128


def _round_up(x, m):
    return -(-x // m) * m


# ------------------------- roll convention probe -----------------------------


@functools.lru_cache(maxsize=None)
def _roll_is_forward():
    """True iff pltpu.roll matches jnp.roll (result[i] = x[i - shift]).

    Tiny one-off probe so the tap-shift sign can never silently flip across
    jax versions; runs eagerly once and is cached.
    """
    def k(x_ref, o_ref):
        o_ref[...] = pltpu.roll(x_ref[...], 1, axis=1)

    x = jnp.tile(jnp.arange(128, dtype=jnp.float32)[None, :], (8, 1))
    y = pl.pallas_call(k, out_shape=jax.ShapeDtypeStruct((8, 128), jnp.float32))(x)
    return bool(np.asarray(y)[0, 0] == 127.0)


# ----------------------------- kernel helpers --------------------------------


def _build_taps(y, mask_ref, taps_ref, *, W, fwd):
    """3x3-neighbourhood im2col of y (C, L) f32 -> taps_ref (9*C, L) bf16.

    Lane shifts use pltpu.roll (XLU slot, no misaligned slices / concatenates);
    each non-centre tap is zeroed where the neighbour leaves the image via a
    precomputed combined row/col mask (one mask row per tap).  Slab rows are
    tap-major: row block t = ky*3 + kx.
    """
    C, L = y.shape
    t = 0
    for dy in (-1, 0, 1):
        for dx in (-1, 0, 1):
            d = dy * W + dx
            if d == 0:
                r = y
            else:
                shift = (-d) % L if fwd else d % L
                r = pltpu.roll(y, shift, axis=1)
                r = r * mask_ref[pl.ds(t, 1), :]          # f32 mask (v5e-friendly)
            taps_ref[pl.ds(t * C, C), :] = r.astype(taps_ref.dtype)
            t += 1


def _conv_stage(xu_ref, xs_ref, mask_ref, w1u_ref, w1s_ref, b1_ref,
                w3_ref, b3_ref, taps1_ref, *, W, fwd):
    """concat -> 1x1 conv (+BN1) -> ReLU -> 3x3 conv (+BN2) -> ReLU, f32."""
    # torch.cat + 1x1 conv == two matmuls accumulating into the same f32 tile
    # (no (Cin, L) concat copy in VMEM).
    y1 = jnp.dot(w1u_ref[...], xu_ref[...], preferred_element_type=jnp.float32)
    y1 = y1 + jnp.dot(w1s_ref[...], xs_ref[...], preferred_element_type=jnp.float32)
    y1 = jnp.maximum(y1 + b1_ref[...], 0.0)
    _build_taps(y1, mask_ref, taps1_ref, W=W, fwd=fwd)
    y2 = jnp.dot(w3_ref[...], taps1_ref[...], preferred_element_type=jnp.float32)
    return jnp.maximum(y2 + b3_ref[...], 0.0)


# ------------------------------ Pallas kernels --------------------------------


def upblok_kernel(xu_ref, xs_ref, mask_ref, w1u_ref, w1s_ref, b1_ref,
                  w3_ref, b3_ref, wd_ref, bd_ref, o_ref, taps1_ref, taps2_ref,
                  *, W, cout, chunks, fwd):
    y2 = _conv_stage(xu_ref, xs_ref, mask_ref, w1u_ref, w1s_ref, b1_ref,
                     w3_ref, b3_ref, taps1_ref, W=W, fwd=fwd)
    # Sub-pixel ConvTranspose2d(k=4, s=2, p=1) over the 3x3-neighbourhood
    # im2col of y2; the four output parity phases are the o_ref row blocks.
    _build_taps(y2, mask_ref, taps2_ref, W=W, fwd=fwd)
    if chunks is None:
        # Small Cout: dense single matmul (zero blocks are free below one
        # MXU K-tile, and one push beats eight).
        out = jnp.dot(wd_ref[...], taps2_ref[...], preferred_element_type=jnp.float32)
        o_ref[...] = (out + bd_ref[...]).astype(o_ref.dtype)
    else:
        # Large Cout: each phase only touches a 2x2 tap subset -> two matmuls
        # over contiguous tap pairs; per-phase writes bound the f32 live range.
        for p in range(4):
            acc = None
            col = 0
            for tap_off, width in chunks[p]:
                w_blk = wd_ref[pl.ds(p * cout, cout), pl.ds(col, width)]
                part = jnp.dot(w_blk, taps2_ref[pl.ds(tap_off, width), :],
                               preferred_element_type=jnp.float32)
                acc = part if acc is None else acc + part
                col += width
            acc = acc + bd_ref[pl.ds(p * cout, cout), :]
            o_ref[pl.ds(p * cout, cout), :] = acc.astype(o_ref.dtype)


def convblock_kernel(xu_ref, xs_ref, mask_ref, w1u_ref, w1s_ref, b1_ref,
                     w3_ref, b3_ref, o_ref, taps1_ref, *, W, fwd):
    # up=False path: stop after the second ReLU.
    y2 = _conv_stage(xu_ref, xs_ref, mask_ref, w1u_ref, w1s_ref, b1_ref,
                     w3_ref, b3_ref, taps1_ref, W=W, fwd=fwd)
    o_ref[...] = y2.astype(o_ref.dtype)


# ------------------------------- parameters -----------------------------------


def init_params(key, in_channels, out_channels):
    """Deterministic synthetic parameters in PyTorch layouts."""
    keys = jax.random.split(key, 14)

    def rnd(k, shape, scale=0.1):
        return scale * jax.random.normal(k, shape, jnp.float32)

    return {
        # Conv2d weight layout: (out, in, kh, kw)
        "conv1x1_w": rnd(keys[0], (in_channels, in_channels, 1, 1)),
        "conv1x1_b": rnd(keys[1], (in_channels,)),
        "bn1_gamma": 1.0 + rnd(keys[2], (in_channels,)),
        "bn1_beta": rnd(keys[3], (in_channels,)),
        "bn1_mean": rnd(keys[4], (in_channels,)),
        "bn1_var": 0.5 + jnp.abs(rnd(keys[5], (in_channels,))),
        "conv3x3_w": rnd(keys[6], (out_channels, in_channels, 3, 3)),
        "conv3x3_b": rnd(keys[7], (out_channels,)),
        "bn2_gamma": 1.0 + rnd(keys[8], (out_channels,)),
        "bn2_beta": rnd(keys[9], (out_channels,)),
        "bn2_mean": rnd(keys[10], (out_channels,)),
        "bn2_var": 0.5 + jnp.abs(rnd(keys[11], (out_channels,))),
        # ConvTranspose2d weight layout: (in, out, kh, kw)
        "deconv_w": rnd(keys[12], (out_channels, out_channels, 4, 4)),
        "deconv_b": rnd(keys[13], (out_channels,)),
    }


def fold_params(p, c_up, sparse_deconv, eps=1e-5):
    """Fold eval-mode BatchNorm into the convs; build kernel-layout weights."""
    cin = p["conv1x1_w"].shape[0]
    cout = p["conv3x3_w"].shape[0]

    s1 = p["bn1_gamma"] / jnp.sqrt(p["bn1_var"] + eps)
    w1 = p["conv1x1_w"][:, :, 0, 0] * s1[:, None]                    # (Cin, Cin)
    w1u = w1[:, :c_up].astype(_CDT)
    w1s = w1[:, c_up:].astype(_CDT)
    b1 = (s1 * (p["conv1x1_b"] - p["bn1_mean"]) + p["bn1_beta"]).reshape(cin, 1)

    s2 = p["bn2_gamma"] / jnp.sqrt(p["bn2_var"] + eps)
    w3 = p["conv3x3_w"] * s2[:, None, None, None]                    # (Cout, Cin, 3, 3)
    # im2col layout: tap index t = ky*3 + kx, column index = t*Cin + ci.
    w3 = jnp.transpose(w3, (0, 2, 3, 1)).reshape(cout, 9 * cin).astype(_CDT)
    b3 = (s2 * (p["conv3x3_b"] - p["bn2_mean"]) + p["bn2_beta"]).reshape(cout, 1)

    # Sub-pixel decomposition of ConvTranspose2d(k=4, s=2, p=1):
    #   out[co, 2i+py, 2j+px] = b[co]
    #     + sum_{dy,dx,ci} W[ci, co, py+1-2dy, px+1-2dx] * y2[ci, i+dy, j+dx]
    # Each phase only touches the 2x2 tap subset dy in {py-1, py}, dx in {px-1, px}.
    dw = p["deconv_w"]                                               # (Cout, Cout, 4, 4)
    phase_rows = []
    for py in (0, 1):
        for px in (0, 1):
            blocks = []
            if sparse_deconv:
                for dy in (py - 1, py):
                    for dx in (px - 1, px):
                        ky, kx = py + 1 - 2 * dy, px + 1 - 2 * dx
                        blocks.append(dw[:, :, ky, kx].T)            # (co, ci)
            else:
                zero = jnp.zeros((cout, cout), jnp.float32)
                for dy in (-1, 0, 1):
                    for dx in (-1, 0, 1):
                        ky, kx = py + 1 - 2 * dy, px + 1 - 2 * dx
                        blocks.append(dw[:, :, ky, kx].T
                                      if 0 <= ky < 4 and 0 <= kx < 4 else zero)
            phase_rows.append(jnp.concatenate(blocks, axis=1))
    wd = jnp.concatenate(phase_rows, axis=0).astype(_CDT)            # (4C, 4C | 9C)
    bd = jnp.tile(p["deconv_b"].reshape(1, cout), (4, 1)).reshape(4 * cout, 1)
    return w1u, w1s, b1, w3, b3, wd, bd


def _deconv_chunks(cout, sparse_deconv):
    """Static (tap_offset, width) chunks per phase for the sparse deconv."""
    if not sparse_deconv:
        return None
    chunks = []
    for py in (0, 1):
        for px in (0, 1):
            base = (py * 3 + px) * cout
            chunks.append(((base, 2 * cout), (base + 3 * cout, 2 * cout)))
    return tuple(chunks)


# ------------------------------ sizing helpers --------------------------------


def _vmem_limit_bytes():
    try:
        cap = int(pltpu.get_tpu_info().vmem_capacity_bytes)
    except Exception:
        cap = 64 * 1024 * 1024            # conservative default (v7x per-TC VMEM)
    return int(max(32 * 1024 * 1024, min(96 * 1024 * 1024, (cap * 3) // 4)))


def _bytes_per_lane(cin, cout, up):
    out_rows = 4 * cout if up else cout
    b = 2 * (2 * cin)                     # double-buffered bf16 xu + xs
    b += 2 * (9 * 4)                      # double-buffered f32 tap masks
    b += 2 * (2 * out_rows)               # double-buffered bf16 output block
    b += 2 * 9 * cin                      # taps1 scratch (bf16)
    b += (2 * 9 * cout) if up else 0      # taps2 scratch (bf16)
    b += 4 * (cin + cout)                 # y1 / y2 f32 temporaries
    b += 4 * (cout if up else 0)          # phase accumulator (f32)
    b += 4 * max(cin, cout)               # rolled-tap f32 temporary
    return int(b * 1.25) + 16             # relayout / scheduling slack


def _choose_grouping(N, S, cin, cout, up, vmem_limit):
    """Pick images-per-grid-step so blocks are lane-wide but fit VMEM."""
    budget = (vmem_limit * 3) // 4
    max_lanes = max(S, (budget // _bytes_per_lane(cin, cout, up)) // _LANE * _LANE)
    target = 8192                          # lanes per step: fill vregs, amortise grid overhead
    cap = min(max_lanes, max(target, S))
    if S % _LANE == 0:
        nb_max = max(1, min(N, cap // S))
        grid = -(-N // nb_max)
        nb = -(-N // grid)                 # balanced groups -> minimal batch padding
        n_pad = nb * grid
        lanes_blk = nb * S
    else:
        # Fallback: single lane-padded block (see TODO at top of file).
        nb, n_pad, grid = N, N, 1
        lanes_blk = _round_up(N * S, _LANE)
    return nb, n_pad, grid, lanes_blk


def _tap_masks(H, W, nb, lanes_blk):
    """(9, lanes_blk) f32 validity masks, one row per 3x3 tap, for nb packed images."""
    S = H * W
    idx = jnp.arange(S, dtype=jnp.int32)
    row, col = idx // W, idx % W
    rows = []
    for dy in (-1, 0, 1):
        for dx in (-1, 0, 1):
            rows.append((row + dy >= 0) & (row + dy < H) &
                        (col + dx >= 0) & (col + dx < W))
    m = jnp.stack(rows).astype(jnp.float32)                          # (9, S)
    m = jnp.tile(m, (1, nb))
    if lanes_blk > nb * S:
        m = jnp.pad(m, ((0, 0), (0, lanes_blk - nb * S)))
    return m


def _pack(x, n_pad, lanes_total):
    """(N, C, H, W) -> channel-major, batch-packed-along-lanes (C, lanes_total)."""
    n, c, h, w = x.shape
    s = h * w
    x = x.reshape(n, c, s)
    if n_pad > n:
        x = jnp.pad(x, ((0, n_pad - n), (0, 0), (0, 0)))
    x = jnp.transpose(x, (1, 0, 2)).reshape(c, n_pad * s)
    if lanes_total > n_pad * s:
        x = jnp.pad(x, ((0, 0), (0, lanes_total - n_pad * s)))
    return x.astype(_CDT)


# --------------------------------- wrapper -------------------------------------


def upblok_forward(upsampled, shortcut, params, up=True):
    """UpBlok.forward.  Inputs/outputs are NCHW float32 (PyTorch convention)."""
    N, c_up, H, W = upsampled.shape
    c_sc = shortcut.shape[1]
    S = H * W
    cin = c_up + c_sc
    cout = params["conv3x3_w"].shape[0]
    # Per-phase deconv only pays off once K=2*Cout fills an MXU K-tile.
    sparse_deconv = bool(up) and (2 * cout >= 128)
    fwd = _roll_is_forward()

    w1u, w1s, b1, w3, b3, wd, bd = fold_params(params, c_up, sparse_deconv)

    vmem_limit = _vmem_limit_bytes()
    nb, n_pad, grid, Lb = _choose_grouping(N, S, cin, cout, up, vmem_limit)
    lanes_total = grid * Lb

    xu = _pack(upsampled, n_pad, lanes_total)
    xs = _pack(shortcut, n_pad, lanes_total)
    masks = _tap_masks(H, W, nb, Lb)

    const = lambda g: (0, 0)
    tile = lambda g: (0, g)
    in_specs = [
        pl.BlockSpec((c_up, Lb), tile),
        pl.BlockSpec((c_sc, Lb), tile),
        pl.BlockSpec((9, Lb), const),
        pl.BlockSpec((cin, c_up), const),
        pl.BlockSpec((cin, c_sc), const),
        pl.BlockSpec((cin, 1), const),
        pl.BlockSpec((cout, 9 * cin), const),
        pl.BlockSpec((cout, 1), const),
    ]
    scratch = [pltpu.VMEM((9 * cin, Lb), _CDT)]
    cparams = pltpu.CompilerParams(
        dimension_semantics=("parallel",),
        vmem_limit_bytes=vmem_limit,
    )

    if not up:
        out = pl.pallas_call(
            functools.partial(convblock_kernel, W=W, fwd=fwd),
            out_shape=jax.ShapeDtypeStruct((cout, lanes_total), _CDT),
            grid=(grid,),
            in_specs=in_specs,
            out_specs=pl.BlockSpec((cout, Lb), tile),
            scratch_shapes=scratch,
            compiler_params=cparams,
        )(xu, xs, masks, w1u, w1s, b1, w3, b3)
        out = out[:, :N * S].reshape(cout, N, H, W)
        return jnp.transpose(out, (1, 0, 2, 3)).astype(jnp.float32)

    chunks = _deconv_chunks(cout, sparse_deconv)
    out = pl.pallas_call(
        functools.partial(upblok_kernel, W=W, cout=cout, chunks=chunks, fwd=fwd),
        out_shape=jax.ShapeDtypeStruct((4 * cout, lanes_total), _CDT),
        grid=(grid,),
        in_specs=in_specs + [
            pl.BlockSpec(wd.shape, const),
            pl.BlockSpec((4 * cout, 1), const),
        ],
        out_specs=pl.BlockSpec((4 * cout, Lb), tile),
        scratch_shapes=scratch + [pltpu.VMEM((9 * cout, Lb), _CDT)],
        compiler_params=cparams,
    )(xu, xs, masks, w1u, w1s, b1, w3, b3, wd, bd)

    # (4*Cout, lanes) bf16, rows [(py,px) phase, cout], lanes [n, i, j]:
    # one XLA transpose interleaves the sub-pixel phases back to NCHW f32.
    out = out[:, :N * S].reshape(2, 2, cout, N, H, W)
    out = jnp.transpose(out, (3, 2, 4, 0, 5, 1)).reshape(N, cout, 2 * H, 2 * W)
    return out.astype(jnp.float32)


# ------------------------- pure-JAX reference (lax) ----------------------------


def upblok_reference(upsampled, shortcut, p, up=True, eps=1e-5):
    x = jnp.concatenate([upsampled, shortcut], axis=1)
    x = jnp.transpose(x, (0, 2, 3, 1)).astype(jnp.float32)
    dn = ("NHWC", "HWIO", "NHWC")

    w1 = jnp.transpose(p["conv1x1_w"], (2, 3, 1, 0))
    y = lax.conv_general_dilated(x, w1, (1, 1), "VALID", dimension_numbers=dn)
    y = y + p["conv1x1_b"]
    y = (y - p["bn1_mean"]) / jnp.sqrt(p["bn1_var"] + eps) * p["bn1_gamma"] + p["bn1_beta"]
    y = jnp.maximum(y, 0.0)

    w3 = jnp.transpose(p["conv3x3_w"], (2, 3, 1, 0))
    y = lax.conv_general_dilated(y, w3, (1, 1), ((1, 1), (1, 1)), dimension_numbers=dn)
    y = y + p["conv3x3_b"]
    y = (y - p["bn2_mean"]) / jnp.sqrt(p["bn2_var"] + eps) * p["bn2_gamma"] + p["bn2_beta"]
    y = jnp.maximum(y, 0.0)

    if up:
        wd = jnp.transpose(p["deconv_w"][:, :, ::-1, ::-1], (2, 3, 0, 1))
        y = lax.conv_general_dilated(y, wd, (1, 1), ((2, 2), (2, 2)),
                                     lhs_dilation=(2, 2), dimension_numbers=dn)
        y = y + p["deconv_b"]
    return jnp.transpose(y, (0, 3, 1, 2))


# ----------------------------------- main --------------------------------------


if __name__ == "__main__":
    def run_case(key, in_channels, out_channels, N, H, W, up):
        k1, k2, k3 = jax.random.split(key, 3)
        c_up = in_channels // 2
        c_sc = in_channels - c_up
        upsampled = jax.random.normal(k1, (N, c_up, H, W), jnp.float32)
        shortcut = jax.random.normal(k2, (N, c_sc, H, W), jnp.float32)
        params = init_params(k3, in_channels, out_channels)
        out = jax.block_until_ready(upblok_forward(upsampled, shortcut, params, up=up))
        ref = upblok_reference(upsampled, shortcut, params, up=up)
        assert out.shape == ref.shape, (out.shape, ref.shape)
        # bf16 MXU operands / bf16 kernel output with f32 accumulation.
        np.testing.assert_allclose(np.asarray(out), np.asarray(ref),
                                   rtol=2e-2, atol=2e-2)

    k1, k2, k3, k4, k5 = jax.random.split(jax.random.PRNGKey(0), 5)
    # Main config: dense deconv path, lane-aligned images, batch packing.
    run_case(k1, 4, 8, N=2, H=16, W=16, up=True)
    # up=False path (conv stack only, no deconv).
    run_case(k2, 4, 8, N=2, H=16, W=16, up=False)
    # Larger Cout: exercises the sparse per-phase deconv path (2*Cout >= 128).
    run_case(k3, 8, 64, N=1, H=16, W=16, up=True)
    # Non-lane-aligned H*W: exercises the lane-padded fallback block.
    run_case(k4, 4, 8, N=2, H=4, W=12, up=True)
    # Larger batch: exercises grid > 1 (pipelined image groups) + batch padding.
    run_case(k5, 4, 8, N=35, H=16, W=16, up=True)

    print("KERNEL_OK")
</pallas_src>

<mosaic_0001>
module attributes {stable_mosaic.version = 11 : i64} {
  func.func @k(%arg0: memref<8x128xf32, #tpu.memory_space<vmem>>, %arg1: memref<8x128xf32, #tpu.memory_space<vmem>>) attributes {dimension_semantics = [], scalar_prefetch = 0 : i64, scratch_operands = 0 : i64, tpu.core_type = #tpu.core_type<tc>} {
    %c0 = arith.constant 0 : index
    %c0_0 = arith.constant 0 : index
    %0 = vector.load %arg0[%c0, %c0_0] : memref<8x128xf32, #tpu.memory_space<vmem>>, vector<8x128xf32>
    %c1_i32 = arith.constant 1 : i32
    %1 = tpu.dynamic_rotate %0 by %c1_i32 dim 1 : vector<8x128xf32>, i32 -> vector<8x128xf32>
    %c0_1 = arith.constant 0 : index
    %c0_2 = arith.constant 0 : index
    %2 = vector.load %arg1[%c0_1, %c0_2] : memref<8x128xf32, #tpu.memory_space<vmem>>, vector<8x128xf32>
    tpu.vector_store %arg1[%c0_1, %c0_2], %1 {strides = array<i32>} : memref<8x128xf32, #tpu.memory_space<vmem>>, vector<8x128xf32>,
    return
  }
}

</mosaic_0001>

<bundles_post_ra>
// kernel: tpu_custom_call.1
= control target key start
LH: loop header
LB: loop body
LE: loop exit
PB: predicated region body
PF: predicated region fallthrough
CT: control target
= control target key end

     0   :  { %6 = vsyncpa [#allocation3], 0  ;;  %s128_s0 = inlined_call_operand.hbm [shape: f32[8,128], index: 0, kind: input, shape index: {}]   ;;  %s129_s1 = inlined_call_operand.hbm [shape: f32[8,128], index: 1, kind: output, shape index: {}]  }
   0x1   :  { %7 = vsyncpa [#allocation4], 0  ;;  %s91_s6 = smov [#allocation2]   ;;  %s43_s10 = scalar_lea.hbm %s128_s0, 128 }
   0x2   :  { %s14_s7 = sshll.u32 %s91_s6, 4  ;;  %p44_p0 = scmp.ne.s32.totalorder %s128_s0, %s43_s10  ;;  %s15_s7 = int_to_ptr.vmem [resolvable:$true] %s14_s7 }
   0x3   :  { %p47_p1 = scmp.lt.u32.totalorder %s43_s10, %s128_s0 }
   0x5   :  { %p49_p2 = pnand %p47_p1, %p44_p0 }
   0x7   :  { %52 = shalt.err (!%p49_p2)
}
   0x8   :  { %s53_s15 = scalar_lea.vmem %s15_s7, 128  ;;  %p58_p4 = scmp.lt.s32.totalorder %s15_s7, %s15_s7 }
   0x9   :  { %p54_p3 = scmp.ne.s32.totalorder %s15_s7, %s53_s15  ;;  %p59_p5 = scmp.lt.s32.totalorder %s53_s15, %s53_s15 }
   0xb   :  { %p60_p6 = por %p59_p5, %p58_p4 }
   0xd   :  { %p61_p7 = pnand %p60_p6, %p54_p3 }
   0xf   :  { %64 = shalt.err (!%p61_p7)
}
  0x10   :  { %17 = dma.hbm_to_vmem [thread:$0]  %s128_s0, 128, %s15_s7, [#allocation3]  }
  0x11   :  { %87 = dma.done.wait [#allocation3], 128  }
  0x12   :  { %88 = vsyncadd [#allocation3], 4294967168  ;;  %v21_v0 = vld [vmem:[#allocation2] sm:$0xff]  ;;  %s92_s18 = smov 1   ;;  %s93_s19 = smov [#allocation5]  }
  0x13   :  { %22 = vrot.lane.b32.xlu0 %v21_v0, %s92_s18  ;;  %s31_s20 = sshll.u32 %s93_s19, 4  ;;  %s32_s20 = int_to_ptr.vmem [resolvable:$true] %s31_s20 }
  0x14   :  { %s65_s21 = scalar_lea.vmem %s32_s20, 128  ;;  %p70_p9 = scmp.lt.s32.totalorder %s32_s20, %s32_s20 }
  0x15   :  { %p66_p8 = scmp.ne.s32.totalorder %s32_s20, %s65_s21  ;;  %p71_p10 = scmp.lt.s32.totalorder %s65_s21, %s65_s21 }
  0x17   :  { %p72_p11 = por %p71_p10, %p70_p9 }
  0x19   :  { %p73_p12 = pnand %p72_p11, %p66_p8 }
  0x85   :  { %v23_v1 = vpop.permute.xlu0 %22 }
  0x86   :  { %24 = vst [vmem:[#allocation5] sm:$0xff] %v23_v1 }
  0x87   :  { %76 = shalt.err (!%p73_p12)
}
  0x88   :  { %s77_s0 = scalar_lea.hbm %s129_s1, 128 }
  0x89   :  { %p78_p13 = scmp.ne.s32.totalorder %s129_s1, %s77_s0  ;;  %p81_p0 = scmp.lt.u32.totalorder %s77_s0, %s129_s1 }
  0x8b   :  { %p83_p1 = pnand %p81_p0, %p78_p13 }
  0x8d   :  { %86 = shalt.err (!%p83_p1)
}
  0x8e   :  { %34 = dma.vmem_to_hbm [thread:$0]  %s32_s20, 128, %s129_s1, [#allocation4]  }
  0x8f   :  { %89 = dma.done.wait [#allocation4], 128  }
  0x90   :  { %90 = vsyncadd [#allocation4], 4294967168 }
  0x91   :  { %38 = vsyncpa [#allocation3], 1 }
  0x92   :  { %39 = vsyncpa [#allocation4], 1 }

</bundles_post_ra>
